<compile_context>
chip_gen: v7x
topology: tpu7x:2x2x1
jax: 0.10.0
libtpu: 0.0.40
codegen_flags: <defaults>
</compile_context>

<pallas_src>
import jax
import jax.numpy as jnp
from jax.experimental import pallas as pl
from jax.experimental.pallas import tpu as pltpu


# ---------------------------------------------------------------------------
# Kernel bodies
# ---------------------------------------------------------------------------

def _dueling_body(x, w1, b1, w2, b2, w_va1, b_va1, w_va2, b_va2):
    """Shared compute: returns (advantage [B,A], value [B,1])."""
    # Shared network: Linear -> ReLU -> Linear -> ReLU
    h = jnp.maximum(jnp.dot(x, w1) + b1, 0.0)
    h = jnp.maximum(jnp.dot(h, w2) + b2, 0.0)
    # Fused value+advantage first layers: one [B,64] x [64,128] matmul.
    va_h = jnp.maximum(jnp.dot(h, w_va1) + b_va1, 0.0)          # [B, 128]
    # Fused second layers via block-diagonal [128, 1+A] weight.
    va = jnp.dot(va_h, w_va2) + b_va2                           # [B, 1+A]
    v = va[:, 0:1]                                              # [B, 1]
    a = va[:, 1:]                                               # [B, A]
    return a, v


def dueling_kernel_single(x_ref,
                          w1_ref, b1_ref, w2_ref, b2_ref,
                          wva1_ref, bva1_ref, wva2_ref, bva2_ref,
                          out_ref):
    """Whole batch in one VMEM-resident call; global mean computed in-kernel."""
    a, v = _dueling_body(x_ref[...],
                         w1_ref[...], b1_ref[...], w2_ref[...], b2_ref[...],
                         wva1_ref[...], bva1_ref[...],
                         wva2_ref[...], bva2_ref[...])
    out_ref[...] = a - jnp.mean(a) + v


def dueling_kernel_tiled(x_ref,
                         w1_ref, b1_ref, w2_ref, b2_ref,
                         wva1_ref, bva1_ref, wva2_ref, bva2_ref,
                         qp_ref, asum_ref):
    """One batch tile per grid step (parallel). Emits q-without-mean plus the
    per-tile sum of the advantage values; the global mean is finished in the
    wrapper (required because the module's mean couples samples across tiles)."""
    a, v = _dueling_body(x_ref[...],
                         w1_ref[...], b1_ref[...], w2_ref[...], b2_ref[...],
                         wva1_ref[...], bva1_ref[...],
                         wva2_ref[...], bva2_ref[...])
    qp_ref[...] = a + v
    asum_ref[...] = jnp.zeros(asum_ref.shape, jnp.float32) + jnp.sum(a)


# ---------------------------------------------------------------------------
# Parameter packing (fusion of the two streams)
# ---------------------------------------------------------------------------

def pack_params(params):
    """(w1,b1,w2,b2,wv1,bv1,wv2,bv2,wa1,ba1,wa2,ba2) ->
       (w1,b1,w2,b2, w_va1 [64,128], b_va1 [1,128],
        w_va2 [128,1+A] block-diag, b_va2 [1,1+A])"""
    (w1, b1, w2, b2, wv1, bv1, wv2, bv2, wa1, ba1, wa2, ba2) = params
    hidden = wv1.shape[0]
    n_act = wa2.shape[1]
    dt = wv2.dtype
    w_va1 = jnp.concatenate([wv1, wa1], axis=1)                 # [64, 128]
    b_va1 = jnp.concatenate([bv1, ba1], axis=1)                 # [1, 128]
    top = jnp.concatenate([wv2, jnp.zeros((hidden, n_act), dt)], axis=1)
    bot = jnp.concatenate([jnp.zeros((hidden, 1), dt), wa2], axis=1)
    w_va2 = jnp.concatenate([top, bot], axis=0)                 # [128, 1+A]
    b_va2 = jnp.concatenate([bv2, ba2], axis=1)                 # [1, 1+A]
    return (w1, b1, w2, b2, w_va1, b_va1, w_va2, b_va2)


# ---------------------------------------------------------------------------
# Wrapper
# ---------------------------------------------------------------------------

def dueling_forward(x, params, *, batch_tile=256):
    """x: [B, state_dim] f32.  params: raw (unfused) parameter tuple."""
    packed = pack_params(params)
    B, state_dim = x.shape
    n_act = packed[-1].shape[-1] - 1   # b_va2 is [1, 1+A]

    # Small / irregular batches: one gridless, fully VMEM-resident call.
    if B % batch_tile != 0 or B < 2 * batch_tile:
        vmem = pl.BlockSpec(memory_space=pltpu.MemorySpace.VMEM)
        return pl.pallas_call(
            dueling_kernel_single,
            out_shape=jax.ShapeDtypeStruct((B, n_act), jnp.float32),
            in_specs=[vmem] * (1 + len(packed)),
            out_specs=vmem,
        )(x, *packed)

    # Large batches: tile rows with a parallel grid; weights stay resident
    # via constant index_maps (only x and q stream through VMEM).
    n_tiles = B // batch_tile
    w_specs = [pl.BlockSpec(p.shape, lambda i: (0, 0)) for p in packed]
    qp, asum = pl.pallas_call(
        dueling_kernel_tiled,
        out_shape=(jax.ShapeDtypeStruct((B, n_act), jnp.float32),
                   jax.ShapeDtypeStruct((n_tiles, 8, 128), jnp.float32)),
        grid=(n_tiles,),
        in_specs=[pl.BlockSpec((batch_tile, state_dim), lambda i: (i, 0))] + w_specs,
        out_specs=(pl.BlockSpec((batch_tile, n_act), lambda i: (i, 0)),
                   pl.BlockSpec((1, 8, 128), lambda i: (i, 0, 0))),
        compiler_params=pltpu.CompilerParams(
            dimension_semantics=("parallel",)),
    )(x, *packed)
    # Finish the GLOBAL mean (cross-tile reduction) exactly as torch does.
    mean_a = jnp.sum(asum[:, 0, 0]) / jnp.float32(B * n_act)
    return qp - mean_a


# ---------------------------------------------------------------------------
# Init + pure-JAX reference
# ---------------------------------------------------------------------------

def init_params(key, state_dim, number_actions, hidden=64):
    """PyTorch-style init: U(-1/sqrt(fan_in), +1/sqrt(fan_in)).
    Weights stored as [in, out]; biases as [1, out]."""
    def linear(k, fan_in, fan_out):
        kw, kb = jax.random.split(k)
        bound = 1.0 / jnp.sqrt(jnp.float32(fan_in))
        w = jax.random.uniform(kw, (fan_in, fan_out), jnp.float32, -bound, bound)
        b = jax.random.uniform(kb, (1, fan_out), jnp.float32, -bound, bound)
        return w, b

    keys = jax.random.split(key, 6)
    w1, b1 = linear(keys[0], state_dim, hidden)
    w2, b2 = linear(keys[1], hidden, hidden)
    wv1, bv1 = linear(keys[2], hidden, hidden)
    wv2, bv2 = linear(keys[3], hidden, 1)
    wa1, ba1 = linear(keys[4], hidden, hidden)
    wa2, ba2 = linear(keys[5], hidden, number_actions)
    return (w1, b1, w2, b2, wv1, bv1, wv2, bv2, wa1, ba1, wa2, ba2)


def dueling_forward_ref(x, params):
    """Pure-JAX reference (unfused), for correctness checking."""
    (w1, b1, w2, b2, wv1, bv1, wv2, bv2, wa1, ba1, wa2, ba2) = params
    h = jnp.maximum(x @ w1 + b1, 0.0)
    h = jnp.maximum(h @ w2 + b2, 0.0)
    v = jnp.maximum(h @ wv1 + bv1, 0.0) @ wv2 + bv2
    a = jnp.maximum(h @ wa1 + ba1, 0.0) @ wa2 + ba2
    return a - jnp.mean(a) + v


if __name__ == "__main__":
    key = jax.random.PRNGKey(0)
    k_x, k_p, k_x2 = jax.random.split(key, 3)

    batch = 8
    state_dim = 32
    number_actions = 8

    params = init_params(k_p, state_dim, number_actions)

    # Small batch -> single fused VMEM-resident kernel (global mean in-kernel).
    x = jax.random.normal(k_x, (batch, state_dim), dtype=jnp.float32)
    q = jax.block_until_ready(dueling_forward(x, params))
    q_ref = dueling_forward_ref(x, params)
    assert q.shape == (batch, number_actions)
    assert jnp.allclose(q, q_ref, atol=1e-4, rtol=1e-4)

    # Larger batch -> batch-tiled parallel-grid path (weights resident,
    # global mean finished via cross-tile reduction in the wrapper).
    big_batch = 1024
    x_big = jax.random.normal(k_x2, (big_batch, state_dim), dtype=jnp.float32)
    q_big = jax.block_until_ready(dueling_forward(x_big, params, batch_tile=256))
    q_big_ref = dueling_forward_ref(x_big, params)
    assert q_big.shape == (big_batch, number_actions)
    assert jnp.allclose(q_big, q_big_ref, atol=1e-4, rtol=1e-4)

    print("KERNEL_OK")
</pallas_src>

<mosaic_0001>
module attributes {stable_mosaic.version = 11 : i64} {
  func.func @dueling_kernel_single(%arg0: memref<8x32xf32, #tpu.memory_space<vmem>>, %arg1: memref<32x64xf32, #tpu.memory_space<vmem>>, %arg2: memref<1x64xf32, #tpu.memory_space<vmem>>, %arg3: memref<64x64xf32, #tpu.memory_space<vmem>>, %arg4: memref<1x64xf32, #tpu.memory_space<vmem>>, %arg5: memref<64x128xf32, #tpu.memory_space<vmem>>, %arg6: memref<1x128xf32, #tpu.memory_space<vmem>>, %arg7: memref<128x9xf32, #tpu.memory_space<vmem>>, %arg8: memref<1x9xf32, #tpu.memory_space<vmem>>, %arg9: memref<8x8xf32, #tpu.memory_space<vmem>>) attributes {dimension_semantics = [], scalar_prefetch = 0 : i64, scratch_operands = 0 : i64, tpu.core_type = #tpu.core_type<tc>} {
    %c0 = arith.constant 0 : index
    %c0_0 = arith.constant 0 : index
    %0 = vector.load %arg0[%c0, %c0_0] : memref<8x32xf32, #tpu.memory_space<vmem>>, vector<8x32xf32>
    %c0_1 = arith.constant 0 : index
    %c0_2 = arith.constant 0 : index
    %1 = vector.load %arg1[%c0_1, %c0_2] : memref<32x64xf32, #tpu.memory_space<vmem>>, vector<32x64xf32>
    %c0_3 = arith.constant 0 : index
    %c0_4 = arith.constant 0 : index
    %2 = vector.load %arg2[%c0_3, %c0_4] : memref<1x64xf32, #tpu.memory_space<vmem>>, vector<1x64xf32>
    %c0_5 = arith.constant 0 : index
    %c0_6 = arith.constant 0 : index
    %3 = vector.load %arg3[%c0_5, %c0_6] : memref<64x64xf32, #tpu.memory_space<vmem>>, vector<64x64xf32>
    %c0_7 = arith.constant 0 : index
    %c0_8 = arith.constant 0 : index
    %4 = vector.load %arg4[%c0_7, %c0_8] : memref<1x64xf32, #tpu.memory_space<vmem>>, vector<1x64xf32>
    %c0_9 = arith.constant 0 : index
    %c0_10 = arith.constant 0 : index
    %5 = vector.load %arg5[%c0_9, %c0_10] : memref<64x128xf32, #tpu.memory_space<vmem>>, vector<64x128xf32>
    %c0_11 = arith.constant 0 : index
    %c0_12 = arith.constant 0 : index
    %6 = vector.load %arg6[%c0_11, %c0_12] : memref<1x128xf32, #tpu.memory_space<vmem>>, vector<1x128xf32>
    %c0_13 = arith.constant 0 : index
    %c0_14 = arith.constant 0 : index
    %7 = vector.load %arg7[%c0_13, %c0_14] : memref<128x9xf32, #tpu.memory_space<vmem>>, vector<128x9xf32>
    %c0_15 = arith.constant 0 : index
    %c0_16 = arith.constant 0 : index
    %8 = vector.load %arg8[%c0_15, %c0_16] : memref<1x9xf32, #tpu.memory_space<vmem>>, vector<1x9xf32>
    %cst = arith.constant dense<0.000000e+00> : vector<8x64xf32>
    %9 = tpu.matmul %0, %1, %cst {dimension_numbers = #tpu.dot_dimension_numbers<[1], [0], [0], [1], [0, 0, 1, 1], [], []>} : vector<8x32xf32>, vector<32x64xf32>, vector<8x64xf32> -> vector<8x64xf32>
    %10 = vector.broadcast %2 : vector<1x64xf32> to vector<8x64xf32>
    %11 = arith.addf %9, %10 : vector<8x64xf32>
    %cst_17 = arith.constant 0.000000e+00 : f32
    %12 = vector.broadcast %cst_17 : f32 to vector<8x64xf32>
    %13 = arith.maximumf %11, %12 : vector<8x64xf32>
    %cst_18 = arith.constant dense<0.000000e+00> : vector<8x64xf32>
    %14 = tpu.matmul %13, %3, %cst_18 {dimension_numbers = #tpu.dot_dimension_numbers<[1], [0], [0], [1], [0, 0, 1, 1], [], []>} : vector<8x64xf32>, vector<64x64xf32>, vector<8x64xf32> -> vector<8x64xf32>
    %15 = vector.broadcast %4 : vector<1x64xf32> to vector<8x64xf32>
    %16 = arith.addf %14, %15 : vector<8x64xf32>
    %cst_19 = arith.constant 0.000000e+00 : f32
    %17 = vector.broadcast %cst_19 : f32 to vector<8x64xf32>
    %18 = arith.maximumf %16, %17 : vector<8x64xf32>
    %cst_20 = arith.constant dense<0.000000e+00> : vector<8x128xf32>
    %19 = tpu.matmul %18, %5, %cst_20 {dimension_numbers = #tpu.dot_dimension_numbers<[1], [0], [0], [1], [0, 0, 1, 1], [], []>} : vector<8x64xf32>, vector<64x128xf32>, vector<8x128xf32> -> vector<8x128xf32>
    %20 = vector.broadcast %6 : vector<1x128xf32> to vector<8x128xf32>
    %21 = arith.addf %19, %20 : vector<8x128xf32>
    %cst_21 = arith.constant 0.000000e+00 : f32
    %22 = vector.broadcast %cst_21 : f32 to vector<8x128xf32>
    %23 = arith.maximumf %21, %22 : vector<8x128xf32>
    %cst_22 = arith.constant dense<0.000000e+00> : vector<8x9xf32>
    %24 = tpu.matmul %23, %7, %cst_22 {dimension_numbers = #tpu.dot_dimension_numbers<[1], [0], [0], [1], [0, 0, 1, 1], [], []>} : vector<8x128xf32>, vector<128x9xf32>, vector<8x9xf32> -> vector<8x9xf32>
    %25 = vector.broadcast %8 : vector<1x9xf32> to vector<8x9xf32>
    %26 = arith.addf %24, %25 : vector<8x9xf32>
    %27 = vector.extract_strided_slice %26 {offsets = [0, 0], sizes = [8, 1], strides = [1, 1]} : vector<8x9xf32> to vector<8x1xf32>
    %28 = vector.extract_strided_slice %26 {offsets = [0, 1], sizes = [8, 8], strides = [1, 1]} : vector<8x9xf32> to vector<8x8xf32>
    %29 = vector.shape_cast %28 : vector<8x8xf32> to vector<1x8x8xf32>
    %cst_23 = arith.constant dense<0.000000e+00> : vector<1xf32>
    %30 = vector.multi_reduction <add>, %29, %cst_23 [1, 2] : vector<1x8x8xf32> to vector<1xf32>
    %31 = vector.shape_cast %30 : vector<1xf32> to vector<1x1x1xf32>
    %32 = vector.extract %31[0, 0, 0] : f32 from vector<1x1x1xf32>
    %cst_24 = arith.constant 6.400000e+01 : f32
    %33 = arith.divf %32, %cst_24 : f32
    %34 = vector.broadcast %33 : f32 to vector<8x8xf32>
    %35 = arith.subf %28, %34 : vector<8x8xf32>
    %36 = vector.broadcast %27 : vector<8x1xf32> to vector<8x8xf32>
    %37 = arith.addf %35, %36 : vector<8x8xf32>
    %c0_25 = arith.constant 0 : index
    %c0_26 = arith.constant 0 : index
    %38 = vector.load %arg9[%c0_25, %c0_26] : memref<8x8xf32, #tpu.memory_space<vmem>>, vector<8x8xf32>
    tpu.vector_store %arg9[%c0_25, %c0_26], %37 {strides = array<i32>} : memref<8x8xf32, #tpu.memory_space<vmem>>, vector<8x8xf32>,
    return
  }
}

</mosaic_0001>

<bundles_post_ra>
// kernel: tpu_custom_call.1
= control target key start
LH: loop header
LB: loop body
LE: loop exit
PB: predicated region body
PF: predicated region fallthrough
CT: control target
= control target key end

     0   :  { %14 = vsyncpa [#allocation3], 0  ;;  %s917_s0 = inlined_call_operand.vmem [shape: f32[8,32], index: 0, kind: input, shape index: {}]   ;;  %s918_s1 = inlined_call_operand.hbm [shape: f32[32,64], index: 1, kind: input, shape index: {}]   ;;  %s919_s2 = inlined_call_operand.vmem [shape: f32[1,64], index: 2, kind: input, shape index: {}]   ;;  %s920_s3 = inlined_call_operand.vmem [shape: f32[64,64], index: 3, kind: input, shape index: {}]   ;;  %s921_s4 = inlined_call_operand.vmem [shape: f32[1,64], index: 4, kind: input, shape index: {}]   ;;  %s922_s5 = inlined_call_operand.vmem [shape: f32[64,128], index: 5, kind: input, shape index: {}]   ;;  %s923_s6 = inlined_call_operand.vmem [shape: f32[1,128], index: 6, kind: input, shape index: {}]   ;;  %s924_s7 = inlined_call_operand.vmem [shape: f32[128,9], index: 7, kind: input, shape index: {}]   ;;  %s925_s8 = inlined_call_operand.vmem [shape: f32[1,9], index: 8, kind: input, shape index: {}]   ;;  %s926_s9 = inlined_call_operand.hbm [shape: f32[8,8], index: 9, kind: output, shape index: {}]  }
   0x1   :  { %15 = vsyncpa [#allocation4], 0  ;;  %s697_s30 = smov [#allocation2]   ;;  %s649_s13 = scalar_lea.hbm %s918_s1, 512 }
   0x2   :  { %s23_s10 = sshll.u32 %s697_s30, 4  ;;  %p650_p0 = scmp.ne.s32.totalorder %s918_s1, %s649_s13  ;;  %s24_s10 = int_to_ptr.vmem [resolvable:$true] %s23_s10 }
   0x3   :  { %p653_p1 = scmp.lt.u32.totalorder %s649_s13, %s918_s1 }
   0x5   :  { %p655_p2 = pnand %p653_p1, %p650_p0 }
   0x7   :  { %658 = shalt.err (!%p655_p2)
}
   0x8   :  { %s659_s18 = scalar_lea.vmem %s24_s10, 512  ;;  %p664_p4 = scmp.lt.s32.totalorder %s24_s10, %s24_s10 }
   0x9   :  { %p660_p3 = scmp.ne.s32.totalorder %s24_s10, %s659_s18  ;;  %p665_p5 = scmp.lt.s32.totalorder %s659_s18, %s659_s18 }
   0xb   :  { %p666_p6 = por %p665_p5, %p664_p4 }
   0xd   :  { %p667_p7 = pnand %p666_p6, %p660_p3 }
   0xf   :  { %670 = shalt.err (!%p667_p7)
}
  0x10   :  { %s698_s19 = smov 128   ;;  %s699_s20 = smov 8  }
  0x11   :  { %29 = dma.hbm_to_vmem [thread:$0]  %s918_s1, 512, %s24_s10, [#allocation3], %s698_s19, %s698_s19, %s699_s20  }
  0x12   :  { %693 = dma.done.wait [#allocation3], 512  }
  0x13   :  { %694 = vsyncadd [#allocation3], 4294966784  ;;  %v700_v0 = vmov 0.0|0.0   ;;  %vm701_vm0 = vmmov 0   ;;  %v702_v1 = vmov 0.0   ;;  %v48_v2 = vld [vmem:[#allocation2] sm:$0xff] }
  0x14   :  { %582 = vmatprep.subr.bf16.mxu0 %v700_v0  ;;  %506 = vmatprep.mubr.msk.f32.mxu0 %vm701_vm0, %v702_v1  ;;  %v49_v3 = vld [vmem:[#allocation2 + $0x8] sm:$0xff]  ;;  %v50_v4 = vld [vmem:[#allocation2 + $0x10] sm:$0xff]  ;;  %v51_v6 = vld [vmem:[#allocation2 + $0x18] sm:$0xff]  ;;  %vm94_vm1 = vcmask 261120   ;;  %vm175_vm2 = vcmask 523264   ;;  %vm410_vm3 = vcmask 64512  }
  0x15   :  { %612 = vmatprep.subr.bf16.mxu1 %v700_v0  ;;  %579 = vmatprep.mubr.msk.f32.mxu1 %vm701_vm0, %v702_v1  ;;  %v583_v5 = vpack.c.bf16 %v49_v3, %v48_v2  ;;  %v586_v7 = vpack.c.bf16 %v51_v6, %v50_v4  ;;  %v53_v8 = vld [vmem:[%s920_s3] sm:$0xff]  ;;  %v54_v9 = vld [vmem:[%s920_s3 + $0x8] sm:$0xff]  ;;  %v55_v12 = vld [vmem:[%s920_s3 + $0x10] sm:$0xff]  ;;  %s705_s21 = smov [#allocation5]  }
  0x16   :  { %v47_v10 = vld [vmem:[%s917_s0] sm:$0xff]  ;;  %v589_v11 = vpack.c.bf16 %v54_v9, %v53_v8  ;;  %v56_v13 = vld [vmem:[%s920_s3 + $0x18] sm:$0xff]  ;;  %v58_v16 = vld [vmem:[%s920_s3 + $0x28] sm:$0xff]  ;;  %v703_v8 = vmov 0   ;;  %s442_s22 = sshll.u32 %s705_s21, 4  ;;  %s443_s22 = int_to_ptr.vmem [resolvable:$true] %s442_s22 }
  0x17   :  { %584 = vmatpush3.bf16.msra.mxu0 %v583_v5  ;;  %v592_v14 = vpack.c.bf16 %v56_v13, %v55_v12  ;;  %v57_v15 = vld [vmem:[%s920_s3 + $0x20] sm:$0xff]  ;;  %v59_v18 = vld [vmem:[%s920_s3 + $0x30] sm:$0xff]  ;;  %v60_v19 = vld [vmem:[%s920_s3 + $0x38] sm:$0xff]  ;;  %647 = vset.pattern.permute.xlu1 %v703_v8  ;;  %s671_s1 = scalar_lea.vmem %s443_s22, 128  ;;  %p676_p9 = scmp.lt.s32.totalorder %s443_s22, %s443_s22 }
  0x18   :  { %585 = vmatprep.subr.bf16.mxu0 %v700_v0  ;;  %v595_v17 = vpack.c.bf16 %v58_v16, %v57_v15  ;;  %v598_v20 = vpack.c.bf16 %v60_v19, %v59_v18  ;;  %v451_v21 = vld [vmem:[%s919_s2] ss:$0 sm:$0xff]  ;;  %v63_v23 = vld [vmem:[%s922_s5 + $0x8] sm:$0xff]  ;;  %v64_v29 = vld [vmem:[%s922_s5 + $0x10] sm:$0xff]  ;;  %648 = vset.pattern.permute.xlu0 %v703_v8  ;;  %p672_p8 = scmp.ne.s32.totalorder %s443_s22, %s671_s1  ;;  %p677_p10 = scmp.lt.s32.totalorder %s671_s1, %s671_s1 }
  0x19   :  { %v62_v22 = vld [vmem:[%s922_s5] sm:$0xff]  ;;  %v65_v30 = vld [vmem:[%s922_s5 + $0x18] sm:$0xff]  ;;  %v67_v33 = vld [vmem:[%s922_s5 + $0x28] sm:$0xff] }
  0x1a   :  { %v601_v27 = vpack.c.bf16 %v63_v23, %v62_v22  ;;  %v604_v31 = vpack.c.bf16 %v65_v30, %v64_v29  ;;  %v66_v32 = vld [vmem:[%s922_s5 + $0x20] sm:$0xff]  ;;  %v68_v35 = vld [vmem:[%s922_s5 + $0x30] sm:$0xff]  ;;  %v69_v36 = vld [vmem:[%s922_s5 + $0x38] sm:$0xff]  ;;  %p678_p11 = por %p677_p10, %p676_p9 }
  0x1b   :  { %587 = vmatpush3.bf16.msra.mxu0 %v586_v7  ;;  %v607_v34 = vpack.c.bf16 %v67_v33, %v66_v32  ;;  %v610_v37 = vpack.c.bf16 %v69_v36, %v68_v35  ;;  %v71_v38 = vld [vmem:[%s924_s7] sm:$0xff]  ;;  %v72_v39 = vld [vmem:[%s924_s7 + $0x8] sm:$0xff]  ;;  %v73_v40 = vld [vmem:[%s924_s7 + $0x10] sm:$0xff] }
  0x1c   :  { %588 = vmatprep.subr.bf16.mxu0 %v700_v0  ;;  %v613_v41 = vpack.c.bf16 %v72_v39, %v71_v38  ;;  %v74_v42 = vld [vmem:[%s924_s7 + $0x18] sm:$0xff]  ;;  %v75_v44 = vld [vmem:[%s924_s7 + $0x20] sm:$0xff]  ;;  %v76_v45 = vld [vmem:[%s924_s7 + $0x28] sm:$0xff]  ;;  %p679_p12 = pnand %p678_p11, %p672_p8 }
  0x1d   :  { %v616_v43 = vpack.c.bf16 %v74_v42, %v73_v40  ;;  %v619_v46 = vpack.c.bf16 %v76_v45, %v75_v44  ;;  %v77_v47 = vld [vmem:[%s924_s7 + $0x30] sm:$0xff]  ;;  %v78_v48 = vld [vmem:[%s924_s7 + $0x38] sm:$0xff]  ;;  %v79_v50 = vld [vmem:[%s924_s7 + $0x40] sm:$0xff] }
  0x1e   :  { %507 = vmatmul.mubr.msk.f32.vlgmr.msra.gmra.mrb[0].mxu0 %vm94_vm1, %v47_v10  ;;  %614 = vmatpush3.bf16.msra.mxu1 %v613_v41  ;;  %v622_v49 = vpack.c.bf16 %v78_v48, %v77_v47  ;;  %v80_v51 = vld [vmem:[%s924_s7 + $0x48] sm:$0xff]  ;;  %v81_v53 = vld [vmem:[%s924_s7 + $0x50] sm:$0xff]  ;;  %v82_v54 = vld [vmem:[%s924_s7 + $0x58] sm:$0xff] }
  0x1f   :  { %590 = vmatpush3.bf16.msra.mxu0 %v589_v11  ;;  %525 = vmatprep.mubr.msk.f32.mxu0 %vm701_vm0, %v702_v1  ;;  %v625_v52 = vpack.c.bf16 %v80_v51, %v79_v50  ;;  %v628_v55 = vpack.c.bf16 %v82_v54, %v81_v53  ;;  %v83_v56 = vld [vmem:[%s924_s7 + $0x60] sm:$0xff]  ;;  %v84_v57 = vld [vmem:[%s924_s7 + $0x68] sm:$0xff]  ;;  %v86_v2 = vld [vmem:[%s924_s7 + $0x78] sm:$0xff] }
  0x20   :  { %591 = vmatprep.subr.bf16.mxu0 %v700_v0  ;;  %615 = vmatprep.subr.bf16.mxu1 %v700_v0  ;;  %v631_v58 = vpack.c.bf16 %v84_v57, %v83_v56  ;;  %v453_v59 = vld [vmem:[%s921_s4] ss:$0 sm:$0xff] }
  0x21   :  { %v457_v9 = vld [vmem:[%s925_s8] ss:$0 sm:$0xff] }
  0x22   :  { %617 = vmatpush3.bf16.msra.mxu1 %v616_v43 }
  0x23   :  { %593 = vmatpush3.bf16.msra.mxu0 %v592_v14  ;;  %618 = vmatprep.subr.bf16.mxu1 %v700_v0 }
  0x24   :  { %594 = vmatprep.subr.bf16.mxu0 %v700_v0 }
  0x26   :  { %620 = vmatpush3.bf16.msra.mxu1 %v619_v46 }
  0x27   :  { %596 = vmatpush3.bf16.msra.mxu0 %v595_v17  ;;  %621 = vmatprep.subr.bf16.mxu1 %v700_v0 }
  0x28   :  { %597 = vmatprep.subr.bf16.mxu0 %v700_v0 }
  0x2a   :  { %623 = vmatpush3.bf16.msra.mxu1 %v622_v49 }
  0x2b   :  { %599 = vmatpush3.bf16.msra.mxu0 %v598_v20  ;;  %624 = vmatprep.subr.bf16.mxu1 %v700_v0 }
  0x2c   :  { %600 = vmatprep.subr.bf16.mxu0 %v700_v0 }
  0x2e   :  { %626 = vmatpush3.bf16.msra.mxu1 %v625_v52 }
  0x2f   :  { %627 = vmatprep.subr.bf16.mxu1 %v700_v0 }
  0x32   :  { %629 = vmatpush3.bf16.msra.mxu1 %v628_v55 }
  0x33   :  { %630 = vmatprep.subr.bf16.mxu1 %v700_v0 }
  0x36   :  { %632 = vmatpush3.bf16.msra.mxu1 %v631_v58 }
  0x37   :  { %633 = vmatprep.subr.bf16.mxu1 %v700_v0 }
  0xf1   :  { %v164_v24 = vpop.f32.mrb[0].mxu0 }
  0xf2   :  { %v165_v25 = vadd.f32 %v451_v21, %v164_v24  ;;  %v508_v26 = vpop.f32.mrb[1].mxu0 }
  0xf4   :  { %v168_v28 = vmax.f32 %v165_v25, 0.0 }
  0xf6   :  { %526 = vmatmul.mubr.msk.f32.vlgmr.msra.gmra.mrb[2].mxu0 %vm175_vm2, %v168_v28 }
  0xf7   :  { %602 = vmatpush3.bf16.msra.mxu0 %v601_v27  ;;  %544 = vmatprep.mubr.msk.f32.mxu0 %vm701_vm0, %v702_v1  ;;  %v85_v1 = vld [vmem:[%s924_s7 + $0x70] sm:$0xff]  ;;  %s704_s7 = smov 127  }
  0xf8   :  { %603 = vmatprep.subr.bf16.mxu0 %v700_v0  ;;  %v634_v3 = vpack.c.bf16 %v86_v2, %v85_v1 }
  0xfa   :  { %635 = vmatpush3.bf16.msra.mxu1 %v634_v3 }
  0xfb   :  { %605 = vmatpush3.bf16.msra.mxu0 %v604_v31 }
  0xfc   :  { %606 = vmatprep.subr.bf16.mxu0 %v700_v0 }
  0xff   :  { %608 = vmatpush3.bf16.msra.mxu0 %v607_v34 }
 0x100   :  { %609 = vmatprep.subr.bf16.mxu0 %v700_v0  ;;  %v455_v0 = vld [vmem:[%s923_s6] ss:$0 sm:$0xff] }
 0x103   :  { %611 = vmatpush3.bf16.msra.mxu0 %v610_v37 }
 0x1c9   :  { %v245_v60 = vpop.f32.mrb[2].mxu0 }
 0x1ca   :  { %v246_v61 = vadd.f32 %v453_v59, %v245_v60  ;;  %v527_v62 = vpop.f32.mrb[3].mxu0 }
 0x1cc   :  { %v249_v63 = vmax.f32 %v246_v61, 0.0 }
 0x1ce   :  { %545 = vmatmul.mubr.msk.f32.vlgmr.msra.gmra.mrb[4].mxu0 %vm175_vm2, %v249_v63 }
 0x2a1   :  { %v325_v4 = vpop.f32.mrb[4].mxu0 }
 0x2a2   :  { %v326_v5 = vadd.f32 %v455_v0, %v325_v4  ;;  %v546_v6 = vpop.f32.mrb[5].mxu0 }
 0x2a4   :  { %v329_v7 = vmax.f32 %v326_v5, 0.0 }
 0x2a6   :  { %580 = vmatmul.mubr.f32.vlgmr.msra.gmra.mrb[0].mxu1 %v329_v7 }
 0x379   :  { %v402_v10 = vpop.f32.mrb[0].mxu1 }
 0x37a   :  { %v403_v11 = vadd.f32 %v457_v9, %v402_v10  ;;  %v581_v12 = vpop.f32.mrb[1].mxu1 }
 0x37c   :  { %427 = vperm.xlu1 %647, %v403_v11   ;;  %407 = vrot.lane.b32.xlu0 %v403_v11, %s704_s7 }
 0x3ee   :  { %v408_v13 = vpop.permute.xlu0 %407 }
 0x3ef   :  { %v411_v14 = vsel %vm410_vm3, %v408_v13, 0.0 }
 0x3f0   :  { %412 = vadd.xlane.f32.xlu0 %v411_v14 }
 0x3fb   :  { %v428_v24 = vpop.permute.xlu1 %427 }
 0x47d   :  { %v413_v15 = vpop.xlane.xlu0 %412 }
 0x47e   :  { %v414_v16 = vrot.slane %v413_v15, 4 }
 0x480   :  { %v415_v17 = vadd.f32 %v414_v16, %v413_v15 }
 0x482   :  { %v416_v18 = vrot.slane %v415_v17, 2 }
 0x484   :  { %v417_v19 = vadd.f32 %v416_v18, %v415_v17 }
 0x486   :  { %v418_v20 = vrot.slane %v417_v19, 1 }
 0x488   :  { %v419_v21 = vadd.f32 %v418_v20, %v417_v19 }
 0x48a   :  { %636 = vpush %v419_v21 }
 0x4bb   :  { %s637_s6 = spop %636 }
 0x4bc   :  { %s423_s8 = smul.f32 0.015625, %s637_s6 }
 0x4be   :  { %v424_v22 = vstv %s423_s8 }
 0x4bf   :  { %v425_v23 = vsub.f32 %v403_v11, %v424_v22 }
 0x4c1   :  { %v430_v25 = vadd.f32 %v428_v24, %v425_v23 }
 0x4c3   :  { %432 = vrot.lane.b32.xlu1 %v430_v25, %s704_s7 }
 0x535   :  { %v433_v26 = vpop.permute.xlu1 %432 }
 0x536   :  { %435 = vst.msk [vmem:[#allocation5] sm:$0xff] %vm410_vm3, %v433_v26 }
 0x537   :  { %682 = shalt.err (!%p679_p12)
}
 0x538   :  { %s683_s24 = scalar_lea.hbm %s926_s9, 128 }
 0x539   :  { %p684_p13 = scmp.ne.s32.totalorder %s926_s9, %s683_s24  ;;  %p687_p0 = scmp.lt.u32.totalorder %s683_s24, %s926_s9 }
 0x53b   :  { %p689_p1 = pnand %p687_p0, %p684_p13 }
 0x53d   :  { %692 = shalt.err (!%p689_p1)
}
 0x53e   :  { %445 = dma.vmem_to_hbm [thread:$0]  %s443_s22, 128, %s926_s9, [#allocation4]  }
 0x53f   :  { %695 = dma.done.wait [#allocation4], 128  }
 0x540   :  { %696 = vsyncadd [#allocation4], 4294967168 }
 0x541   :  { %449 = vsyncpa [#allocation3], 1 }
 0x542   :  { %450 = vsyncpa [#allocation4], 1 }

</bundles_post_ra>
